<compile_context>
chip_gen: v7x
topology: tpu7x:2x2x1
jax: 0.10.0
libtpu: 0.0.40
codegen_flags: <defaults>
</compile_context>

<pallas_src>
import functools

import jax
import jax.numpy as jnp
from jax.experimental import pallas as pl
from jax.experimental.pallas import tpu as pltpu


def _round_up(x, m):
    return ((x + m - 1) // m) * m


def multimodal_kernel(x1_ref, x2_ref,
                      w1_ref, b1_ref,
                      w2_ref, b2_ref,
                      w3a_ref, w3b_ref, b3_ref,
                      out_ref):
    # Branch 1: fc1 + ReLU.  Activations arrive in f32 and are cast to bf16
    # here (in-kernel cast hides under the MXU); accumulate in f32.
    h1 = jnp.dot(x1_ref[...].astype(w1_ref.dtype), w1_ref[...],
                 preferred_element_type=jnp.float32)
    h1 = jnp.maximum(h1 + b1_ref[...], 0.0)
    # Consume h1 immediately (fc3 partial on the first half of the split
    # weights) so only one (TB, H) f32 intermediate is live at a time.
    # fc3 stays in f32: K=H, N=2 is negligible MXU work and avoids
    # re-quantizing the intermediates.
    acc = jnp.dot(h1, w3a_ref[...], preferred_element_type=jnp.float32)

    # Branch 2: fc2 + ReLU, then its fc3 partial.
    h2 = jnp.dot(x2_ref[...].astype(w2_ref.dtype), w2_ref[...],
                 preferred_element_type=jnp.float32)
    h2 = jnp.maximum(h2 + b2_ref[...], 0.0)
    acc = acc + jnp.dot(h2, w3b_ref[...], preferred_element_type=jnp.float32)

    # cat((h1, h2), 1) @ W3 + b3  ==  h1 @ W3a + h2 @ W3b + b3.
    out_ref[...] = (acc + b3_ref[...]).astype(out_ref.dtype)


@functools.partial(jax.jit, static_argnames=("block_b",))
def multimodal_forward(x1, x2, params, *, block_b=1024):
    """params: w1 (D1,H), b1 (1,H), w2 (D2,H), b2 (1,H), w3a (H,2), w3b (H,2), b3 (1,2)."""
    B, D1 = x1.shape
    D2 = x2.shape[1]
    H = params["w1"].shape[1]
    n_out = params["w3a"].shape[1]
    compute_dtype = jnp.bfloat16

    # ---- Batch tile: multiple of 8 (sublane), capped at block_b.  Prefer a
    # grid of >= 2 steps when the batch allows it (v7x has 2 TensorCores).
    TB = max(8, _round_up(min(block_b, B), 8))
    if B >= 16 and _round_up(B, TB) // TB < 2:
        TB = _round_up((B + 1) // 2, 8)
    Bp = _round_up(B, TB)
    if Bp != B:
        # Zero padding keeps the padded rows garbage-free; they are sliced off.
        x1 = jnp.pad(x1, ((0, Bp - B), (0, 0)))
        x2 = jnp.pad(x2, ((0, Bp - B), (0, 0)))
    grid = (Bp // TB,)

    # ---- Operand dtypes: activations stay f32 (cast to bf16 in-kernel),
    # fc1/fc2 weights bf16 (MXU fast path), biases and fc3 weights f32.
    x1 = x1.astype(jnp.float32)
    x2 = x2.astype(jnp.float32)
    w1 = params["w1"].astype(compute_dtype)
    w2 = params["w2"].astype(compute_dtype)
    b1 = params["b1"].astype(jnp.float32)
    b2 = params["b2"].astype(jnp.float32)
    w3a = params["w3a"].astype(jnp.float32)
    w3b = params["w3b"].astype(jnp.float32)
    b3 = params["b3"].astype(jnp.float32)

    # ---- Residency guard: all weights stay VMEM-resident across grid steps.
    weight_bytes = (D1 + D2) * H * 2 + (2 * H + 2 * H * n_out + n_out) * 4
    # TODO(synk): add an H-tiled ("arbitrary" grid axis) fc1/fc2 path with f32
    # partial sums for fc3 when resident weights approach ~40 MiB (v7x VMEM).
    if weight_bytes > (40 << 20):
        raise ValueError(
            f"fc weights ({weight_bytes / 2**20:.1f} MiB) exceed the "
            "VMEM-resident budget; an H-tiled fallback is required.")

    tiled = lambda i: (i, 0)
    resident = lambda i: (0, 0)

    def _resident_spec(shape):
        # Constant index_map -> block never re-fetched; single-buffer it so the
        # resident weights do not pay the default 2x double-buffer VMEM.
        return pl.BlockSpec(shape, resident, pipeline_mode=pl.Buffered(1))

    in_specs = [
        pl.BlockSpec((TB, D1), tiled),   # x1 tile (f32, cast in-kernel)
        pl.BlockSpec((TB, D2), tiled),   # x2 tile
        _resident_spec((D1, H)),         # w1 (bf16)
        _resident_spec((1, H)),          # b1 (f32)
        _resident_spec((D2, H)),         # w2 (bf16)
        _resident_spec((1, H)),          # b2 (f32)
        _resident_spec((H, n_out)),      # w3a (f32)
        _resident_spec((H, n_out)),      # w3b (f32)
        _resident_spec((1, n_out)),      # b3 (f32)
    ]
    # Narrow (TB, 2) output: full-extent last dim; the masked partial stores are
    # negligible next to 64x less writeback than a 128-lane zero pad.
    out_specs = pl.BlockSpec((TB, n_out), tiled)
    out_shape = jax.ShapeDtypeStruct((Bp, n_out), jnp.float32)

    # ---- VMEM budget: double-buffered activation/output tiles, single-buffered
    # resident weights, one live (TB, H) f32 intermediate, scratch headroom.
    vmem_bytes = int(
        2 * TB * (D1 + D2 + n_out) * 4   # pipelined x1/x2/out tiles (f32)
        + weight_bytes                   # single-buffered resident weights
        + 2 * TB * H * 4                 # live f32 intermediate + slack
        + (4 << 20))                     # compiler scratch headroom
    try:
        device_vmem = pltpu.get_tpu_info().vmem_capacity_bytes
    except Exception:
        device_vmem = 64 << 20           # conservative: v7x per-TC VMEM
    vmem_cap = max(32 << 20, device_vmem - (16 << 20))

    flops = 2 * Bp * H * (D1 + D2 + 2 * n_out) + 4 * Bp * H
    bytes_accessed = Bp * (D1 + D2 + n_out) * 4 + weight_bytes

    out = pl.pallas_call(
        multimodal_kernel,
        out_shape=out_shape,
        grid=grid,
        in_specs=in_specs,
        out_specs=out_specs,
        compiler_params=pltpu.CompilerParams(
            dimension_semantics=("parallel",),
            vmem_limit_bytes=min(vmem_bytes, vmem_cap),
        ),
        cost_estimate=pl.CostEstimate(
            flops=flops, transcendentals=0, bytes_accessed=bytes_accessed),
    )(x1, x2, w1, b1, w2, b2, w3a, w3b, b3)

    # Strip batch padding only; the output width is already exactly n_out.
    return out[:B]


def init_params(key, input_size1, input_size2, hidden_size):
    """Deterministic init mimicking nn.Linear's U(-1/sqrt(fan_in), 1/sqrt(fan_in))."""
    ks = jax.random.split(key, 6)

    def lin(kw, kb, fan_in, fan_out):
        bound = 1.0 / jnp.sqrt(fan_in)
        w = jax.random.uniform(kw, (fan_in, fan_out), jnp.float32, -bound, bound)
        b = jax.random.uniform(kb, (1, fan_out), jnp.float32, -bound, bound)
        return w, b

    w1, b1 = lin(ks[0], ks[1], input_size1, hidden_size)
    w2, b2 = lin(ks[2], ks[3], input_size2, hidden_size)
    w3, b3 = lin(ks[4], ks[5], hidden_size * 2, 2)
    return {
        "w1": w1, "b1": b1,
        "w2": w2, "b2": b2,
        "w3a": w3[:hidden_size, :],   # acts on out1 (first half of the concat)
        "w3b": w3[hidden_size:, :],   # acts on out2 (second half of the concat)
        "b3": b3,
    }


def reference_forward(x1, x2, params):
    """Pure-JAX f32 reference matching the PyTorch module."""
    h1 = jnp.maximum(x1 @ params["w1"] + params["b1"], 0.0)
    h2 = jnp.maximum(x2 @ params["w2"] + params["b2"], 0.0)
    combined = jnp.concatenate([h1, h2], axis=1)
    w3 = jnp.concatenate([params["w3a"], params["w3b"]], axis=0)
    return combined @ w3 + params["b3"]


if __name__ == "__main__":
    B, D1, D2, H = 8, 16, 32, 32
    key = jax.random.PRNGKey(0)
    k1, k2, kp = jax.random.split(key, 3)
    x1 = jax.random.normal(k1, (B, D1), jnp.float32)
    x2 = jax.random.normal(k2, (B, D2), jnp.float32)
    params = init_params(kp, D1, D2, H)

    out = multimodal_forward(x1, x2, params)
    out = jax.block_until_ready(out)

    ref = reference_forward(x1, x2, params)
    assert out.shape == (B, 2), out.shape
    # bf16 fc1/fc2 operands with f32 accumulation -> relaxed tolerance vs f32.
    assert jnp.allclose(out, ref, atol=2e-2, rtol=2e-2), "mismatch vs reference"
    print("KERNEL_OK")
</pallas_src>

<mosaic_0001>
module attributes {stable_mosaic.version = 11 : i64} {
  func.func @multimodal_kernel(%arg0: i32, %arg1: memref<8x16xf32, #tpu.memory_space<vmem>>, %arg2: memref<8x32xf32, #tpu.memory_space<vmem>>, %arg3: memref<16x32xbf16, #tpu.memory_space<vmem>>, %arg4: memref<1x32xf32, #tpu.memory_space<vmem>>, %arg5: memref<32x32xbf16, #tpu.memory_space<vmem>>, %arg6: memref<1x32xf32, #tpu.memory_space<vmem>>, %arg7: memref<32x2xf32, #tpu.memory_space<vmem>>, %arg8: memref<32x2xf32, #tpu.memory_space<vmem>>, %arg9: memref<1x2xf32, #tpu.memory_space<vmem>>, %arg10: memref<8x2xf32, #tpu.memory_space<vmem>>) attributes {dimension_semantics = [#tpu.dimension_semantics<parallel>], iteration_bounds = array<i64: 1>, scalar_prefetch = 0 : i64, scratch_operands = 0 : i64, tpu.core_type = #tpu.core_type<tc>, window_params = [{transform_indices = @transform_0, window_bounds = array<i64: 8, 16>}, {transform_indices = @transform_1, window_bounds = array<i64: 8, 32>}, {pipeline_mode = #tpu.pipeline_mode<synchronous>, transform_indices = @transform_2, window_bounds = array<i64: 16, 32>}, {pipeline_mode = #tpu.pipeline_mode<synchronous>, transform_indices = @transform_3, window_bounds = array<i64: 1, 32>}, {pipeline_mode = #tpu.pipeline_mode<synchronous>, transform_indices = @transform_4, window_bounds = array<i64: 32, 32>}, {pipeline_mode = #tpu.pipeline_mode<synchronous>, transform_indices = @transform_5, window_bounds = array<i64: 1, 32>}, {pipeline_mode = #tpu.pipeline_mode<synchronous>, transform_indices = @transform_6, window_bounds = array<i64: 32, 2>}, {pipeline_mode = #tpu.pipeline_mode<synchronous>, transform_indices = @transform_7, window_bounds = array<i64: 32, 2>}, {pipeline_mode = #tpu.pipeline_mode<synchronous>, transform_indices = @transform_8, window_bounds = array<i64: 1, 2>}, {transform_indices = @transform_9, window_bounds = array<i64: 8, 2>}]} {
    %c0 = arith.constant 0 : index
    %c0_0 = arith.constant 0 : index
    %0 = vector.load %arg1[%c0, %c0_0] : memref<8x16xf32, #tpu.memory_space<vmem>>, vector<8x16xf32>
    %1 = arith.truncf %0 : vector<8x16xf32> to vector<8x16xbf16>
    %c0_1 = arith.constant 0 : index
    %c0_2 = arith.constant 0 : index
    %2 = vector.load %arg3[%c0_1, %c0_2] : memref<16x32xbf16, #tpu.memory_space<vmem>>, vector<16x32xbf16>
    %cst = arith.constant dense<0.000000e+00> : vector<8x32xf32>
    %3 = tpu.matmul %1, %2, %cst {dimension_numbers = #tpu.dot_dimension_numbers<[1], [0], [0], [1], [0, 0, 1, 1], [], []>} : vector<8x16xbf16>, vector<16x32xbf16>, vector<8x32xf32> -> vector<8x32xf32>
    %c0_3 = arith.constant 0 : index
    %c0_4 = arith.constant 0 : index
    %4 = vector.load %arg4[%c0_3, %c0_4] : memref<1x32xf32, #tpu.memory_space<vmem>>, vector<1x32xf32>
    %5 = vector.broadcast %4 : vector<1x32xf32> to vector<8x32xf32>
    %6 = arith.addf %3, %5 : vector<8x32xf32>
    %cst_5 = arith.constant 0.000000e+00 : f32
    %7 = vector.broadcast %cst_5 : f32 to vector<8x32xf32>
    %8 = arith.maximumf %6, %7 : vector<8x32xf32>
    %c0_6 = arith.constant 0 : index
    %c0_7 = arith.constant 0 : index
    %9 = vector.load %arg7[%c0_6, %c0_7] : memref<32x2xf32, #tpu.memory_space<vmem>>, vector<32x2xf32>
    %cst_8 = arith.constant dense<0.000000e+00> : vector<8x2xf32>
    %10 = tpu.matmul %8, %9, %cst_8 {dimension_numbers = #tpu.dot_dimension_numbers<[1], [0], [0], [1], [0, 0, 1, 1], [], []>} : vector<8x32xf32>, vector<32x2xf32>, vector<8x2xf32> -> vector<8x2xf32>
    %c0_9 = arith.constant 0 : index
    %c0_10 = arith.constant 0 : index
    %11 = vector.load %arg2[%c0_9, %c0_10] : memref<8x32xf32, #tpu.memory_space<vmem>>, vector<8x32xf32>
    %12 = arith.truncf %11 : vector<8x32xf32> to vector<8x32xbf16>
    %c0_11 = arith.constant 0 : index
    %c0_12 = arith.constant 0 : index
    %13 = vector.load %arg5[%c0_11, %c0_12] : memref<32x32xbf16, #tpu.memory_space<vmem>>, vector<32x32xbf16>
    %cst_13 = arith.constant dense<0.000000e+00> : vector<8x32xf32>
    %14 = tpu.matmul %12, %13, %cst_13 {dimension_numbers = #tpu.dot_dimension_numbers<[1], [0], [0], [1], [0, 0, 1, 1], [], []>} : vector<8x32xbf16>, vector<32x32xbf16>, vector<8x32xf32> -> vector<8x32xf32>
    %c0_14 = arith.constant 0 : index
    %c0_15 = arith.constant 0 : index
    %15 = vector.load %arg6[%c0_14, %c0_15] : memref<1x32xf32, #tpu.memory_space<vmem>>, vector<1x32xf32>
    %16 = vector.broadcast %15 : vector<1x32xf32> to vector<8x32xf32>
    %17 = arith.addf %14, %16 : vector<8x32xf32>
    %cst_16 = arith.constant 0.000000e+00 : f32
    %18 = vector.broadcast %cst_16 : f32 to vector<8x32xf32>
    %19 = arith.maximumf %17, %18 : vector<8x32xf32>
    %c0_17 = arith.constant 0 : index
    %c0_18 = arith.constant 0 : index
    %20 = vector.load %arg8[%c0_17, %c0_18] : memref<32x2xf32, #tpu.memory_space<vmem>>, vector<32x2xf32>
    %cst_19 = arith.constant dense<0.000000e+00> : vector<8x2xf32>
    %21 = tpu.matmul %19, %20, %cst_19 {dimension_numbers = #tpu.dot_dimension_numbers<[1], [0], [0], [1], [0, 0, 1, 1], [], []>} : vector<8x32xf32>, vector<32x2xf32>, vector<8x2xf32> -> vector<8x2xf32>
    %22 = arith.addf %10, %21 : vector<8x2xf32>
    %c0_20 = arith.constant 0 : index
    %c0_21 = arith.constant 0 : index
    %23 = vector.load %arg9[%c0_20, %c0_21] : memref<1x2xf32, #tpu.memory_space<vmem>>, vector<1x2xf32>
    %24 = vector.broadcast %23 : vector<1x2xf32> to vector<8x2xf32>
    %25 = arith.addf %22, %24 : vector<8x2xf32>
    %c0_22 = arith.constant 0 : index
    %c0_23 = arith.constant 0 : index
    %26 = vector.load %arg10[%c0_22, %c0_23] : memref<8x2xf32, #tpu.memory_space<vmem>>, vector<8x2xf32>
    tpu.vector_store %arg10[%c0_22, %c0_23], %25 {strides = array<i32>} : memref<8x2xf32, #tpu.memory_space<vmem>>, vector<8x2xf32>,
    return
  }
  func.func @transform_0(%arg0: i32) -> (i32, i32) {
    %c0_i32 = arith.constant 0 : i32
    %c0_i32_0 = arith.constant 0 : i32
    return %arg0, %c0_i32 : i32, i32
  }
  func.func @transform_1(%arg0: i32) -> (i32, i32) {
    %c0_i32 = arith.constant 0 : i32
    %c0_i32_0 = arith.constant 0 : i32
    return %arg0, %c0_i32 : i32, i32
  }
  func.func @transform_2(%arg0: i32) -> (i32, i32) {
    %c0_i32 = arith.constant 0 : i32
    %c0_i32_0 = arith.constant 0 : i32
    %c0_i32_1 = arith.constant 0 : i32
    return %c0_i32, %c0_i32_0 : i32, i32
  }
  func.func @transform_3(%arg0: i32) -> (i32, i32) {
    %c0_i32 = arith.constant 0 : i32
    %c0_i32_0 = arith.constant 0 : i32
    %c0_i32_1 = arith.constant 0 : i32
    return %c0_i32, %c0_i32_0 : i32, i32
  }
  func.func @transform_4(%arg0: i32) -> (i32, i32) {
    %c0_i32 = arith.constant 0 : i32
    %c0_i32_0 = arith.constant 0 : i32
    %c0_i32_1 = arith.constant 0 : i32
    return %c0_i32, %c0_i32_0 : i32, i32
  }
  func.func @transform_5(%arg0: i32) -> (i32, i32) {
    %c0_i32 = arith.constant 0 : i32
    %c0_i32_0 = arith.constant 0 : i32
    %c0_i32_1 = arith.constant 0 : i32
    return %c0_i32, %c0_i32_0 : i32, i32
  }
  func.func @transform_6(%arg0: i32) -> (i32, i32) {
    %c0_i32 = arith.constant 0 : i32
    %c0_i32_0 = arith.constant 0 : i32
    %c0_i32_1 = arith.constant 0 : i32
    return %c0_i32, %c0_i32_0 : i32, i32
  }
  func.func @transform_7(%arg0: i32) -> (i32, i32) {
    %c0_i32 = arith.constant 0 : i32
    %c0_i32_0 = arith.constant 0 : i32
    %c0_i32_1 = arith.constant 0 : i32
    return %c0_i32, %c0_i32_0 : i32, i32
  }
  func.func @transform_8(%arg0: i32) -> (i32, i32) {
    %c0_i32 = arith.constant 0 : i32
    %c0_i32_0 = arith.constant 0 : i32
    %c0_i32_1 = arith.constant 0 : i32
    return %c0_i32, %c0_i32_0 : i32, i32
  }
  func.func @transform_9(%arg0: i32) -> (i32, i32) {
    %c0_i32 = arith.constant 0 : i32
    %c0_i32_0 = arith.constant 0 : i32
    return %arg0, %c0_i32 : i32, i32
  }
}

</mosaic_0001>

<bundles_post_ra>
// kernel: multimodal_forward.1
= control target key start
LH: loop header
LB: loop body
LE: loop exit
PB: predicated region body
PF: predicated region fallthrough
CT: control target
= control target key end

     0   :  { %v412_v0 = vmov 0.0   ;;  %vm413_vm0 = vmmov 0   ;;  %vm50_vm1 = vcmask 130048   ;;  %v414_v7 = vmov 0.0|0.0   ;;  %s523_s4 = inlined_call_operand.vmem [shape: bf16[32,32], index: 4, kind: input, shape index: {}]   ;;  %s524_s2 = inlined_call_operand.vmem [shape: bf16[16,32], index: 2, kind: input, shape index: {}]   ;;  %s525_s0 = inlined_call_operand.vmem [shape: f32[8,16], index: 0, kind: input, shape index: {}]   ;;  %s526_s1 = inlined_call_operand.vmem [shape: f32[8,32], index: 1, kind: input, shape index: {}]   ;;  %s527_s6 = inlined_call_operand.vmem [shape: f32[32,2], index: 6, kind: input, shape index: {}]   ;;  %s528_s7 = inlined_call_operand.vmem [shape: f32[32,2], index: 7, kind: input, shape index: {}]   ;;  %s529_s3 = inlined_call_operand.vmem [shape: f32[1,32], index: 3, kind: input, shape index: {}]   ;;  %s530_s5 = inlined_call_operand.vmem [shape: f32[1,32], index: 5, kind: input, shape index: {}]   ;;  %s531_s8 = inlined_call_operand.vmem [shape: f32[1,2], index: 8, kind: input, shape index: {}]   ;;  %s532_s9 = inlined_call_operand.vmem [shape: f32[8,2], index: 9, kind: output, shape index: {}]  }
   0x1   :  { %364 = vmatprep.subr.bf16.mxu1 %v412_v0  ;;  %358 = vmatprep.subr.bf16.mxu0 %v412_v0  ;;  %v409_v1 = vld [vmem:[%s523_s4] sm:$0xff]   ;;  %v411_v5 = vld [vmem:[%s523_s4 + $0x8] sm:$0xff]   ;;  %vm124_vm2 = vcmask 261120   ;;  %v97_v15 = vld [vmem:[%s527_s6 + $0x10] sm:$0xff]  ;;  %vm327_vm3 = vcmask 15360  }
   0x2   :  { %v410_v2 = vld [vmem:[%s524_s2] sm:$0xff]   ;;  %360 = vmatprep.mubr.msk.bf16.mxu0 %vm413_vm0, %v412_v0  ;;  %368 = vmatprep.mubr.msk.bf16.mxu1 %vm413_vm0, %v412_v0  ;;  %v96_v10 = vld [vmem:[%s527_s6 + $0x8] sm:$0xff]  ;;  %v98_v16 = vld [vmem:[%s527_s6 + $0x18] sm:$0xff] }
   0x3   :  { %365 = vmatpush3.bf16.msra.mxu1 %v409_v1  ;;  %v33_v3 = vld [vmem:[%s525_s0] sm:$0xff]  ;;  %359 = vmatpush3.bf16.msra.mxu0 %v410_v2  ;;  %v170_v12 = vld [vmem:[%s528_s7 + $0x8] sm:$0xff]  ;;  %v171_v17 = vld [vmem:[%s528_s7 + $0x10] sm:$0xff]  ;;  %v404_v19 = vpack.c.bf16 %v98_v16, %v97_v15 }
   0x4   :  { %366 = vmatprep.subr.bf16.mxu1 %v412_v0  ;;  %v34_v4 = vpack.c.bf16 %v33_v3, %v33_v3  ;;  %v99_v6 = vld [vmem:[%s526_s1] sm:$0xff]  ;;  %394 = vmatprep.subr.bf16.mxu0 %v414_v7  ;;  %v172_v18 = vld [vmem:[%s528_s7 + $0x18] sm:$0xff] }
   0x5   :  { %v100_v8 = vpack.c.bf16 %v99_v6, %v99_v6  ;;  %v95_v9 = vld [vmem:[%s527_s6] sm:$0xff]  ;;  %v398_v20 = vpack.c.bf16 %v172_v18, %v171_v17 }
   0x6   :  { %361 = vmatmul.mubr.msk.bf16.vlgmr.msra.gmra.mrb[0].mxu0 %vm50_vm1, %v34_v4  ;;  %v169_v11 = vld [vmem:[%s528_s7] sm:$0xff]  ;;  %v401_v13 = vpack.c.bf16 %v96_v10, %v95_v9 }
   0x7   :  { %367 = vmatpush3.bf16.msra.mxu1 %v411_v5  ;;  %380 = vmatprep.mubr.msk.f32.mxu0 %vm413_vm0, %v412_v0  ;;  %v395_v14 = vpack.c.bf16 %v170_v12, %v169_v11  ;;  %v333_v21 = vld [vmem:[%s529_s3] ss:$0 sm:$0xff] }
   0x8   :  { %400 = vmatprep.subr.bf16.mxu1 %v414_v7  ;;  %v336_v25 = vld [vmem:[%s530_s5] ss:$0 sm:$0xff] }
   0x9   :  { %396 = vmatpush3.bf16.msra.mxu0 %v395_v14  ;;  %v342_v38 = vld [vmem:[%s531_s8] ss:$0 sm:$0xff] }
   0xa   :  { %369 = vmatmul.mubr.msk.bf16.vlgmr.msra.gmra.mrb[0].mxu1 %vm124_vm2, %v100_v8  ;;  %397 = vmatprep.subr.bf16.mxu0 %v414_v7 }
   0xb   :  { %391 = vmatprep.mubr.msk.f32.mxu1 %vm413_vm0, %v412_v0  ;;  %402 = vmatpush3.bf16.msra.mxu1 %v401_v13 }
   0xc   :  { %403 = vmatprep.subr.bf16.mxu1 %v414_v7 }
   0xd   :  { %399 = vmatpush3.bf16.msra.mxu0 %v398_v20 }
   0xf   :  { %405 = vmatpush3.bf16.msra.mxu1 %v404_v19 }
  0xd9   :  { %v88_v22 = vpop.f32.mrb[0].mxu0 }
  0xda   :  { %v89_v23 = vadd.f32 %v333_v21, %v88_v22  ;;  %v362_v24 = vpop.f32.mrb[1].mxu0 }
  0xdb   :  { %v91_v26 = vpop.f32.mrb[2].mxu0 }
  0xdc   :  { %v94_v27 = vmax.f32 %v89_v23, 0.0  ;;  %v363_v28 = vpop.f32.mrb[3].mxu0 }
  0xdd   :  { %v162_v29 = vpop.f32.mrb[0].mxu1 }
  0xde   :  { %v163_v30 = vadd.f32 %v336_v25, %v162_v29  ;;  %v370_v31 = vpop.f32.mrb[1].mxu1  ;;  %392 = vmatmul.mubr.msk.f32.vlgmr.msra.gmra.mrb[4].mxu1 %vm124_vm2, %v94_v27 }
  0xdf   :  { %v165_v32 = vpop.f32.mrb[2].mxu1 }
  0xe0   :  { %v168_v33 = vmax.f32 %v163_v30, 0.0  ;;  %v371_v34 = vpop.f32.mrb[3].mxu1 }
  0xe2   :  { %381 = vmatmul.mubr.msk.f32.vlgmr.msra.gmra.mrb[4].mxu0 %vm124_vm2, %v168_v33 }
 0x1b1   :  { %v315_v35 = vpop.f32.mrb[4].mxu1 }
 0x1b2   :  { %v393_v36 = vpop.f32.mrb[5].mxu1 }
 0x1b5   :  { %v242_v37 = vpop.f32.mrb[4].mxu0 }
 0x1b6   :  { %v316_v39 = vadd.f32 %v315_v35, %v242_v37  ;;  %v382_v40 = vpop.f32.mrb[5].mxu0 }
 0x1b8   :  { %v326_v41 = vadd.f32 %v342_v38, %v316_v39 }
 0x1ba   :  { %328 = vst.msk [vmem:[%s532_s9] sm:$0xff] %vm327_vm3, %v326_v41 }

</bundles_post_ra>
